<compile_context>
chip_gen: v6e
topology: v6e:2x2x1
jax: 0.10.0
libtpu: 0.0.40
codegen_flags: <defaults>
</compile_context>

<pallas_src>
import functools

import jax
import jax.numpy as jnp
from jax.experimental import pallas as pl
from jax.experimental.pallas import tpu as pltpu


def _round_up(v, m):
    return ((v + m - 1) // m) * m


def _feature_slice(term, incomplete):
    """Contiguous feature-column range actually read by the selected term."""
    if not incomplete:
        return 0, 5
    try:
        return {"first": (0, 2), "second": (2, 3), "third": (3, 5)}[term]
    except KeyError:
        raise ValueError(f"unknown term {term!r}") from None


def _tiling(n, block_rows=None):
    """Pick (total_rows, lanes, block_rows) for the (nf, R, C) layout."""
    lanes = 1024 if n >= 8 * 1024 else 128          # lane-dense, multiple of 128
    rows = _round_up(max(1, -(-n // lanes)), 8)     # sublane multiple of 8
    if block_rows is None:
        block_rows = 256                            # 256*1024*4B = 1 MiB / feature plane
    block_rows = _round_up(max(8, int(block_rows)), 8)
    block_rows = min(block_rows, rows)
    rows = _round_up(rows, block_rows)              # grid divides evenly
    return rows, lanes, block_rows


def _friedman_kernel(p_ref, x_ref, y_ref, *, term, incomplete, constant):
    # p_ref: SMEM (7,) f32 = [p0, p1, p2, p3, p4, p5, c]
    # x_ref: VMEM (nf, bR, C) f32  (dense feature planes, model order)
    # y_ref: VMEM (bR, C) f32
    p = p_ref
    if incomplete:
        if term == "first":
            y = p[0] * jnp.sin(p[1] * x_ref[0] * x_ref[1])
        elif term == "second":
            d = x_ref[0] - p[3]
            y = p[2] * d * d
        elif term == "third":
            y = p[4] * x_ref[0] + p[5] * x_ref[1]
        else:
            raise ValueError(f"unknown term {term!r}")
    else:
        d = x_ref[2] - p[3]
        y = (
            p[0] * jnp.sin(p[1] * x_ref[0] * x_ref[1])
            + p[2] * d * d
            + p[4] * x_ref[3]
            + p[5] * x_ref[4]
        )
    if constant:
        y = y + p[6]
    y_ref[...] = y


def friedman_forward(x, params, *, term="first", incomplete=False,
                     constant=False, block_rows=None):
    """x: (N, F>=5) f32; params: (7,) f32 [p0..p5, c]. Returns (N,) f32."""
    x = jnp.asarray(x, jnp.float32)
    params = jnp.asarray(params, jnp.float32).reshape(-1)
    if x.ndim != 2 or x.shape[1] < 5:
        raise ValueError("x must have shape (N, F) with F >= 5")
    if params.shape[0] < 7:
        raise ValueError("params must hold [p0..p5, c]")
    n = x.shape[0]

    f_lo, f_hi = _feature_slice(term, incomplete)
    nf = f_hi - f_lo

    # TODO(synk): this feature-major transpose is one extra HBM pass; store x
    # feature-major upstream (or fuse into the producer) to remove it.
    x_t = jnp.transpose(x[:, f_lo:f_hi])            # (nf, N)

    rows, lanes, brows = _tiling(n, block_rows)
    padded_n = rows * lanes
    if padded_n != n:
        x_t = jnp.pad(x_t, ((0, 0), (0, padded_n - n)))
    x_3d = x_t.reshape(nf, rows, lanes)

    kernel = functools.partial(
        _friedman_kernel, term=term, incomplete=incomplete, constant=constant
    )
    y = pl.pallas_call(
        kernel,
        out_shape=jax.ShapeDtypeStruct((rows, lanes), jnp.float32),
        grid=(rows // brows,),
        in_specs=[
            pl.BlockSpec(memory_space=pltpu.MemorySpace.SMEM),       # params (7,)
            pl.BlockSpec((nf, brows, lanes), lambda i: (0, i, 0)),   # x tiles
        ],
        out_specs=pl.BlockSpec((brows, lanes), lambda i: (i, 0)),
        compiler_params=pltpu.CompilerParams(
            dimension_semantics=("parallel",),       # megacore on v7x
            vmem_limit_bytes=48 * 1024 * 1024,       # >> 12 MiB double-buffered footprint
        ),
    )(params, x_3d)
    return y.reshape(padded_n)[:n]


def _reference(x, params, *, term, incomplete, constant):
    p0, p1, p2, p3, p4, p5, c = (params[i] for i in range(7))
    if incomplete:
        if term == "first":
            y = p0 * jnp.sin(p1 * x[:, 0] * x[:, 1])
        elif term == "second":
            y = p2 * (x[:, 2] - p3) ** 2
        else:
            y = p4 * x[:, 3] + p5 * x[:, 4]
    else:
        y = (
            p0 * jnp.sin(p1 * x[:, 0] * x[:, 1])
            + p2 * (x[:, 2] - p3) ** 2
            + p4 * x[:, 3]
            + p5 * x[:, 4]
        )
    if constant:
        y = y + c
    return y


if __name__ == "__main__":
    key = jax.random.PRNGKey(0)
    kx, kp = jax.random.split(key)

    # Scalar parameters p0..p5 and constant c (mirrors torch.rand(1) per param).
    params = jax.random.uniform(kp, (7,), dtype=jnp.float32)

    ok = True
    for n in (16, 1000):
        kx, sub = jax.random.split(kx)
        x = jax.random.uniform(sub, (n, 5), dtype=jnp.float32)
        for term, incomplete, constant in [
            ("first", False, False),   # complete Friedman model
            ("first", False, True),    # complete + constant
            ("first", True, False),
            ("second", True, True),
            ("third", True, False),
        ]:
            y = friedman_forward(x, params, term=term,
                                 incomplete=incomplete, constant=constant)
            y = jax.block_until_ready(y)
            y_ref = _reference(x, params, term=term,
                               incomplete=incomplete, constant=constant)
            if y.shape != (n,) or not jnp.allclose(y, y_ref, atol=1e-5, rtol=1e-5):
                ok = False

    # Exercise the multi-step pipelined grid with a forced small block size.
    kx, sub = jax.random.split(kx)
    xg = jax.random.uniform(sub, (4096, 5), dtype=jnp.float32)
    yg = jax.block_until_ready(
        friedman_forward(xg, params, term="first", incomplete=False,
                         constant=True, block_rows=8))
    yg_ref = _reference(xg, params, term="first", incomplete=False, constant=True)
    if not jnp.allclose(yg, yg_ref, atol=1e-5, rtol=1e-5):
        ok = False

    if ok:
        print("KERNEL_OK")
</pallas_src>

<mosaic_0001>
module attributes {stable_mosaic.version = 11 : i64} {
  func.func @_friedman_kernel(%arg0: i32, %arg1: memref<7xf32, #tpu.memory_space<smem>>, %arg2: memref<5x8x128xf32, #tpu.memory_space<vmem>>, %arg3: memref<8x128xf32, #tpu.memory_space<vmem>>) attributes {dimension_semantics = [#tpu.dimension_semantics<parallel>], iteration_bounds = array<i64: 1>, scalar_prefetch = 0 : i64, scratch_operands = 0 : i64, tpu.core_type = #tpu.core_type<tc>, window_params = [{transform_indices = @transform_0, window_bounds = array<i64: 7>}, {transform_indices = @transform_1, window_bounds = array<i64: 5, 8, 128>}, {transform_indices = @transform_2, window_bounds = array<i64: 8, 128>}]} {
    %c2 = arith.constant 2 : index
    %c0 = arith.constant 0 : index
    %c0_0 = arith.constant 0 : index
    %0 = vector.load %arg2[%c2, %c0, %c0_0] : memref<5x8x128xf32, #tpu.memory_space<vmem>>, vector<1x8x128xf32>
    %1 = vector.shape_cast %0 : vector<1x8x128xf32> to vector<8x128xf32>
    %c3 = arith.constant 3 : index
    %2 = memref.load %arg1[%c3] : memref<7xf32, #tpu.memory_space<smem>>
    %3 = vector.broadcast %2 : f32 to vector<8x128xf32>
    %4 = arith.subf %1, %3 : vector<8x128xf32>
    %c0_1 = arith.constant 0 : index
    %5 = memref.load %arg1[%c0_1] : memref<7xf32, #tpu.memory_space<smem>>
    %c1 = arith.constant 1 : index
    %6 = memref.load %arg1[%c1] : memref<7xf32, #tpu.memory_space<smem>>
    %c0_2 = arith.constant 0 : index
    %c0_3 = arith.constant 0 : index
    %c0_4 = arith.constant 0 : index
    %7 = vector.load %arg2[%c0_2, %c0_3, %c0_4] : memref<5x8x128xf32, #tpu.memory_space<vmem>>, vector<1x8x128xf32>
    %8 = vector.shape_cast %7 : vector<1x8x128xf32> to vector<8x128xf32>
    %9 = vector.broadcast %6 : f32 to vector<8x128xf32>
    %10 = arith.mulf %9, %8 : vector<8x128xf32>
    %c1_5 = arith.constant 1 : index
    %c0_6 = arith.constant 0 : index
    %c0_7 = arith.constant 0 : index
    %11 = vector.load %arg2[%c1_5, %c0_6, %c0_7] : memref<5x8x128xf32, #tpu.memory_space<vmem>>, vector<1x8x128xf32>
    %12 = vector.shape_cast %11 : vector<1x8x128xf32> to vector<8x128xf32>
    %13 = arith.mulf %10, %12 : vector<8x128xf32>
    %14 = math.sin %13 : vector<8x128xf32>
    %15 = vector.broadcast %5 : f32 to vector<8x128xf32>
    %16 = arith.mulf %15, %14 : vector<8x128xf32>
    %c2_8 = arith.constant 2 : index
    %17 = memref.load %arg1[%c2_8] : memref<7xf32, #tpu.memory_space<smem>>
    %18 = vector.broadcast %17 : f32 to vector<8x128xf32>
    %19 = arith.mulf %18, %4 : vector<8x128xf32>
    %20 = arith.mulf %19, %4 : vector<8x128xf32>
    %21 = arith.addf %16, %20 : vector<8x128xf32>
    %c4 = arith.constant 4 : index
    %22 = memref.load %arg1[%c4] : memref<7xf32, #tpu.memory_space<smem>>
    %c3_9 = arith.constant 3 : index
    %c0_10 = arith.constant 0 : index
    %c0_11 = arith.constant 0 : index
    %23 = vector.load %arg2[%c3_9, %c0_10, %c0_11] : memref<5x8x128xf32, #tpu.memory_space<vmem>>, vector<1x8x128xf32>
    %24 = vector.shape_cast %23 : vector<1x8x128xf32> to vector<8x128xf32>
    %25 = vector.broadcast %22 : f32 to vector<8x128xf32>
    %26 = arith.mulf %25, %24 : vector<8x128xf32>
    %27 = arith.addf %21, %26 : vector<8x128xf32>
    %c5 = arith.constant 5 : index
    %28 = memref.load %arg1[%c5] : memref<7xf32, #tpu.memory_space<smem>>
    %c4_12 = arith.constant 4 : index
    %c0_13 = arith.constant 0 : index
    %c0_14 = arith.constant 0 : index
    %29 = vector.load %arg2[%c4_12, %c0_13, %c0_14] : memref<5x8x128xf32, #tpu.memory_space<vmem>>, vector<1x8x128xf32>
    %30 = vector.shape_cast %29 : vector<1x8x128xf32> to vector<8x128xf32>
    %31 = vector.broadcast %28 : f32 to vector<8x128xf32>
    %32 = arith.mulf %31, %30 : vector<8x128xf32>
    %33 = arith.addf %27, %32 : vector<8x128xf32>
    %c0_15 = arith.constant 0 : index
    %c0_16 = arith.constant 0 : index
    %34 = vector.load %arg3[%c0_15, %c0_16] : memref<8x128xf32, #tpu.memory_space<vmem>>, vector<8x128xf32>
    tpu.vector_store %arg3[%c0_15, %c0_16], %33 {strides = array<i32>} : memref<8x128xf32, #tpu.memory_space<vmem>>, vector<8x128xf32>,
    return
  }
  func.func @transform_0(%arg0: i32) -> i32 {
    %c0_i32 = arith.constant 0 : i32
    %c0_i32_0 = arith.constant 0 : i32
    return %c0_i32 : i32
  }
  func.func @transform_1(%arg0: i32) -> (i32, i32, i32) {
    %c0_i32 = arith.constant 0 : i32
    %c0_i32_0 = arith.constant 0 : i32
    %c0_i32_1 = arith.constant 0 : i32
    return %c0_i32, %arg0, %c0_i32_0 : i32, i32, i32
  }
  func.func @transform_2(%arg0: i32) -> (i32, i32) {
    %c0_i32 = arith.constant 0 : i32
    %c0_i32_0 = arith.constant 0 : i32
    return %arg0, %c0_i32 : i32, i32
  }
}

</mosaic_0001>

<bundles_post_ra>
// kernel: tpu_custom_call.1
= control target key start
LH: loop header
LB: loop body
LE: loop exit
PB: predicated region body
PF: predicated region fallthrough
CT: control target
= control target key end

     0   :  { %7 = vsyncpa [#allocation5], 0  ;;  %s328_s0 = inlined_call_operand.hbm [shape: f32[7], index: 0, kind: input, shape index: {}]   ;;  %s329_s1 = inlined_call_operand.hbm [shape: f32[5,8,128], index: 1, kind: input, shape index: {}]   ;;  %s330_s2 = inlined_call_operand.hbm [shape: f32[8,128], index: 2, kind: output, shape index: {}]  }
   0x1   :  { %8 = vsyncpa [#allocation3], 0 }
   0x2   :  { %9 = vsyncpa [#allocation4], 0  ;;  %s272_s9 = smov [#allocation2]   ;;  %s273_s12 = smov [#allocation6]  }
   0x3   :  { %17 = dma.hbm_to_smem %s328_s0, 16, %s272_s9, [#allocation5]  }
   0x4   :  { %s23_s13 = sshll.u32 %s273_s12, 4  ;;  %s24_s13 = int_to_ptr.vmem [resolvable:$true] %s23_s13 }
   0x5   :  { %s234_s14 = scalar_lea.vmem %s24_s13, 640  ;;  %p239_p1 = scmp.lt.s32.totalorder %s24_s13, %s24_s13 }
   0x6   :  { %p235_p0 = scmp.ne.s32.totalorder %s24_s13, %s234_s14  ;;  %p240_p2 = scmp.lt.s32.totalorder %s234_s14, %s234_s14 }
   0x8   :  { %p241_p3 = por %p240_p2, %p239_p1 }
   0xa   :  { %p242_p4 = pnand %p241_p3, %p235_p0 }
   0xc   :  { %245 = shalt.err (!%p242_p4)
}
   0xd   :  { %s274_s15 = smov 128   ;;  %s275_s16 = smov 8  }
   0xe   :  { %29 = dma.hbm_to_vmem [thread:$0]  %s329_s1, 640, %s24_s13, [#allocation3], %s274_s15, %s274_s15, %s275_s16  }
   0xf   :  { %266 = dma.done.wait [#allocation5], 16  }
  0x10   :  { %267 = vsyncadd [#allocation5], 4294967280 }
  0x11   :  { %268 = dma.done.wait [#allocation3], 640  }
  0x12   :  { %269 = vsyncadd [#allocation3], 4294966656 }
  0x13   :  { %36 = sfence }
  0x14   :  { %s191_s0 = sld [smem:[#allocation2 + $0x1]]  ;;  %v44_v0 = vld [vmem:[#allocation6] sm:$0xff]  ;;  %v48_v2 = vld [vmem:[#allocation6 + $0x8] sm:$0xff]  ;;  %v276_v16 = vmov 683565275   ;;  %s282_s23 = smov [#allocation7]  }
  0x15   :  { %v277_v18 = vmov 2475754826   ;;  %v278_v20 = vmov 2131351028   ;;  %v279_v22 = vmov 2102212464  }
  0x16   :  { %v280_v24 = vmov 920167782   ;;  %v281_v31 = vmov 1326507024   ;;  %s190_s1 = sld [smem:[#allocation2 + $0x3]]  ;;  %s180_s24 = sshll.u32 %s282_s23, 4  ;;  %s181_s24 = int_to_ptr.vmem [resolvable:$true] %s180_s24 }
  0x17   :  { %s196_s19 = sld [smem:[#allocation2 + $0x2]]  ;;  %s246_s25 = scalar_lea.vmem %s181_s24, 128 }
  0x18   :  { %s42_s20 = sld [smem:[#allocation2]]  ;;  %p247_p5 = scmp.ne.s32.totalorder %s181_s24, %s246_s25 }
  0x19   :  { %s197_s21 = sld [smem:[#allocation2 + $0x4]]  ;;  %p251_p6 = scmp.lt.s32.totalorder %s181_s24, %s181_s24 }
  0x1a   :  { %v45_v1 = vstv %s191_s0  ;;  %s198_s22 = sld [smem:[#allocation2 + $0x5]]  ;;  %p252_p7 = scmp.lt.s32.totalorder %s246_s25, %s246_s25 }
  0x1b   :  { %v46_v3 = vmul.f32 %v45_v1, %v44_v0 }
  0x1c   :  { %p253_p8 = por %p252_p7, %p251_p6 }
  0x1d   :  { %v304_v4 = vmul.f32 %v48_v2, %v46_v3 }
  0x1e   :  { %p254_p9 = pnand %p253_p8, %p247_p5 }
  0x1f   :  { %v53_v5 = vand.u32 2139095040, %v304_v4  ;;  %v50_v7 = vand.u32 2147483647, %v304_v4  ;;  %vm52_vm7 = vcmp.lt.s32.totalorder %v304_v4, 0  ;;  %vm142_vm12 = vweird.f32 %v304_v4 }
  0x21   :  { %v54_v6 = vshrl.u32 %v53_v5, 23  ;;  %v57_v10 = vand.u32 8388607, %v50_v7  ;;  %vm51_vm8 = vcmp.le.f32.partialorder %v50_v7, 0.7853982 }
  0x23   :  { %v192_v8 = vadd.s32 4294967169, %v54_v6  ;;  %v58_v13 = vor.u32 8388608, %v57_v10 }
  0x25   :  { %v60_v9 = vadd.s32 1, %v192_v8  ;;  %v98_v33 = vshll.u32 %v58_v13, 8 }
  0x27   :  { %vm61_vm0 = vcmp.gt.s32.totalorder %v60_v9, 0 }
  0x28   :  { %v62_v11 = vsel %vm61_vm0, %v60_v9, 0 }
  0x29   :  { %v64_v12 = vand.u32 31, %v62_v11  ;;  %v63_v14 = vshrl.u32 %v62_v11, 5 }
  0x2b   :  { %v65_v15 = vsub.s32 32, %v64_v12  ;;  %v67_v17 = vshll.u32 %v276_v16, %v64_v12  ;;  %v70_v19 = vshll.u32 %v277_v18, %v64_v12  ;;  %v73_v21 = vshll.u32 %v278_v20, %v64_v12 }
  0x2c   :  { %v76_v23 = vshll.u32 %v279_v22, %v64_v12  ;;  %v79_v25 = vshll.u32 %v280_v24, %v64_v12  ;;  %vm82_vm1 = vcmp.lt.s32.totalorder %v63_v14, 1  ;;  %vm85_vm2 = vcmp.lt.s32.totalorder %v63_v14, 4 }
  0x2d   :  { %v66_v26 = vshrl.u32 %v276_v16, %v65_v15  ;;  %v68_v27 = vshrl.u32 %v277_v18, %v65_v15  ;;  %v71_v28 = vshrl.u32 %v278_v20, %v65_v15  ;;  %v74_v29 = vshrl.u32 %v279_v22, %v65_v15 }
  0x2e   :  { %v77_v30 = vshrl.u32 %v280_v24, %v65_v15  ;;  %v80_v32 = vshrl.u32 %v281_v31, %v65_v15  ;;  %vm83_vm3 = vcmp.lt.s32.totalorder %v63_v14, 2  ;;  %vm84_vm4 = vcmp.lt.s32.totalorder %v63_v14, 3 }
  0x2f   :  { %v69_v34 = vor.u32 %v68_v27, %v67_v17  ;;  %v72_v35 = vor.u32 %v71_v28, %v70_v19  ;;  %v75_v36 = vor.u32 %v74_v29, %v73_v21  ;;  %v157_v29 = vstv %s196_s19 }
  0x30   :  { %v78_v37 = vor.u32 %v77_v30, %v76_v23  ;;  %v81_v38 = vor.u32 %v80_v32, %v79_v25  ;;  %v38_v25 = vld [vmem:[#allocation6 + $0x10] sm:$0xff] }
  0x31   :  { %v86_v39 = vsel %vm82_vm1, %v66_v26, %v69_v34  ;;  %v87_v40 = vsel %vm85_vm2, %v75_v36, 2102212464  ;;  %v90_v41 = vsel %vm82_vm1, %v69_v34, %v72_v35  ;;  %v94_v42 = vsel %vm82_vm1, %v72_v35, %v75_v36 }
  0x32   :  { %v88_v43 = vsel %vm84_vm4, %v72_v35, %v87_v40  ;;  %v91_v44 = vsel %vm85_vm2, %v78_v37, 920167782  ;;  %v95_v45 = vsel %vm85_vm2, %v81_v38, 1326507024  ;;  %v40_v26 = vstv %s190_s1 }
  0x33   :  { %v92_v46 = vsel %vm84_vm4, %v75_v36, %v91_v44  ;;  %v96_v47 = vsel %vm84_vm4, %v78_v37, %v95_v45  ;;  %v89_v48 = vsel %vm83_vm3, %v86_v39, %v88_v43  ;;  %v41_v28 = vsub.f32 %v38_v25, %v40_v26  ;;  %v163_v37 = vld [vmem:[#allocation6 + $0x18] sm:$0xff] }
  0x34   :  { %v93_v49 = vsel %vm83_vm3, %v90_v41, %v92_v46  ;;  %v97_v50 = vsel %vm83_vm3, %v94_v42, %v96_v47  ;;  %v105_v55 = vmul.u32 %v98_v33, %v89_v48  ;;  %v154_v36 = vstv %s42_s20  ;;  %v169_v42 = vld [vmem:[#allocation6 + $0x20] sm:$0xff] }
  0x35   :  { %v310_v51 = vmul.u32.u64.low %v98_v33, %v97_v50  ;;  %v311_v52 = vmul.u32.u64.high %v98_v33, %v97_v50, %v310_v51  ;;  %v313_v53 = vmul.u32.u64.low %v98_v33, %v93_v49  ;;  %v314_v54 = vmul.u32.u64.high %v98_v33, %v93_v49, %v313_v53 }
  0x36   :  { %v158_v32 = vmul.f32 %v157_v29, %v41_v28  ;;  %v164_v38 = vstv %s197_s21  ;;  %v170_v43 = vstv %s198_s22 }
  0x37   :  { %vm107_vm5 = vc.u32 %v311_v52, %v313_v53  ;;  %v108_v56 = vadd.s32 1, %v314_v54  ;;  %v106_v3 = vadd.s32 %v313_v53, %v311_v52  ;;  %v165_v45 = vmul.f32 %v164_v38, %v163_v37 }
  0x38   :  { %v159_v40 = vmul.f32 %v158_v32, %v41_v28  ;;  %v171_v47 = vmul.f32 %v170_v43, %v169_v42 }
  0x39   :  { %v109_v57 = vsel %vm107_vm5, %v108_v56, %v314_v54 }
  0x3a   :  { %v110_v58 = vadd.s32 %v109_v57, %v105_v55 }
  0x3c   :  { %v111_v59 = vadd.s32 536870912, %v110_v58 }
  0x3e   :  { %v112_v60 = vshrl.u32 %v111_v59, 30 }
  0x40   :  { %v113_v61 = vshll.u32 %v112_v60, 30  ;;  %v136_v18 = vsub.s32 4, %v112_v60 }
  0x42   :  { %v114_v62 = vsub.s32 %v110_v58, %v113_v61  ;;  %v137_v21 = vsel %vm52_vm7, %v136_v18, %v112_v60 }
  0x43   :  { %v139_v23 = vsel %vm51_vm8, 0, %v137_v21 }
  0x44   :  { %v116_v63 = vsub.s32 0, %v114_v62  ;;  %v143_v24 = vadd.s32 3, %v139_v23 }
  0x46   :  { %v193_v0 = vmin.u32 %v116_v63, %v114_v62  ;;  %v144_v27 = vand.u32 3, %v143_v24 }
  0x48   :  { %v118_v1 = vclz %v193_v0  ;;  %vm149_vm9 = vcmp.eq.s32.totalorder %v144_v27, 2  ;;  %vm146_vm10 = vcmp.eq.s32.totalorder %v144_v27, 0  ;;  %vm145_vm11 = vcmp.lt.s32.totalorder %v144_v27, 2 }
  0x4a   :  { %v194_v2 = vadd.s32 4294967294, %v118_v1 }
  0x4c   :  { %vm195_vm6 = vcmp.lt.s32.totalorder %v194_v2, 0 }
  0x4d   :  { %v121_v5 = vsel %vm195_vm6, 0, %v194_v2 }
  0x4e   :  { %v122_v6 = vsub.s32 32, %v121_v5  ;;  %v123_v8 = vshll.u32 %v114_v62, %v121_v5  ;;  %v126_v9 = vsub.s32 4294967266, %v121_v5 }
  0x50   :  { %v124_v10 = vshrl.u32 %v106_v3, %v122_v6  ;;  %v127_v11 = vadd.s32 127, %v126_v9 }
  0x52   :  { %v125_v12 = vor.u32 %v124_v10, %v123_v8  ;;  %v128_v13 = vshll.u32 %v127_v11, 23 }
  0x54   :  { %v129_v14 = vor.u32 4788187, %v128_v13  ;;  %v132_v15 = vcvt.s32.f32 %v125_v12 }
  0x56   :  { %v130_v16 = vand.u32 2147483647, %v129_v14 }
  0x58   :  { %v133_v17 = vmul.f32 %v132_v15, %v130_v16 }
  0x5a   :  { %v134_v19 = vxor.u32 2147483648, %v133_v17 }
  0x5c   :  { %v135_v20 = vsel %vm52_vm7, %v134_v19, %v133_v17 }
  0x5d   :  { %v138_v22 = vsel %vm51_vm8, %v304_v4, %v135_v20 }
  0x5e   :  { %214 = vcosq.f32 %v138_v22 }
  0x5f   :  { %216 = vsinq.f32 %v138_v22 }
  0x6b   :  { %v215_v7 = vpop.eup %214 }
  0x6c   :  { %v217_v30 = vpop.eup %216  ;;  %v150_v31 = vxor.u32 2147483648, %v215_v7 }
  0x6d   :  { %v147_v33 = vxor.u32 2147483648, %v217_v30 }
  0x6e   :  { %v151_v34 = vsel %vm149_vm9, %v150_v31, %v217_v30 }
  0x6f   :  { %v148_v35 = vsel %vm146_vm10, %v215_v7, %v147_v33 }
  0x70   :  { %v152_v39 = vsel %vm145_vm11, %v148_v35, %v151_v34 }
  0x71   :  { %v153_v41 = vsel %vm142_vm12, nan, %v152_v39 }
  0x72   :  { %v155_v44 = vmul.f32 %v154_v36, %v153_v41 }
  0x74   :  { %v160_v46 = vadd.f32 %v159_v40, %v155_v44 }
  0x76   :  { %v166_v48 = vadd.f32 %v165_v45, %v160_v46 }
  0x78   :  { %v172_v49 = vadd.f32 %v171_v47, %v166_v48 }
  0x7a   :  { %173 = vst [vmem:[#allocation7] sm:$0xff] %v172_v49 }
  0x7b   :  { %257 = shalt.err (!%p254_p9)
}
  0x7c   :  { %183 = dma.vmem_to_hbm [thread:$0]  %s181_s24, 128, %s330_s2, [#allocation4]  }
  0x7d   :  { %270 = dma.done.wait [#allocation4], 128  }
  0x7e   :  { %271 = vsyncadd [#allocation4], 4294967168 }
  0x7f   :  { %187 = vsyncpa [#allocation3], 1 }
  0x80   :  { %188 = vsyncpa [#allocation4], 1 }
  0x81   :  { %189 = vsyncpa [#allocation5], 1 }

</bundles_post_ra>
